<compile_context>
chip_gen: v6e
topology: v6e:2x2x1
jax: 0.10.0
libtpu: 0.0.40
codegen_flags: <defaults>
</compile_context>

<pallas_src>
import functools

import jax
import jax.numpy as jnp
from jax.experimental import pallas as pl
from jax.experimental.pallas import tpu as pltpu


def _round_up(x, m):
    return ((x + m - 1) // m) * m


def _attn_kernel(proj_ref, enc_ref, *rest, has_mask, s_len, ts, s_padded):
    """Online-softmax attention over one (TB, TS, Hp) encoder block."""
    if has_mask:
        mask_ref, out_ref, m_sc, l_sc, acc_sc = rest
    else:
        mask_ref = None
        out_ref, m_sc, l_sc, acc_sc = rest

    si = pl.program_id(1)

    @pl.when(si == 0)
    def _init():
        m_sc[...] = jnp.full_like(m_sc, -jnp.inf)
        l_sc[...] = jnp.zeros_like(l_sc)
        acc_sc[...] = jnp.zeros_like(acc_sc)

    proj = proj_ref[...]                                       # (TB, Hp) f32
    enc = enc_ref[...]                                         # (TB, TS, Hp)

    # score[b, s] = <enc[b, s, :], proj[b, :]>  (lane-axis reduce, no transposes).
    # Cast enc inline (not bound to a name) so the cast fuses into the multiply.
    score = jnp.sum(enc.astype(jnp.float32) * proj[:, None, :], axis=-1)  # (TB, TS)

    if has_mask:
        mask = mask_ref[...].astype(jnp.float32)
        score = score * mask                                   # multiplicative mask

    if s_padded:
        # Force padded sequence positions out of the softmax denominator.
        pos = si * ts + jax.lax.broadcasted_iota(jnp.int32, score.shape, 1)
        score = jnp.where(pos < s_len, score, -jnp.inf)

    # Online (streaming) softmax update, all in f32.
    m_prev = m_sc[...]
    m_new = jnp.maximum(m_prev, jnp.max(score, axis=-1, keepdims=True))
    alpha = jnp.exp(m_prev - m_new)
    p = jnp.exp(score - m_new)                                 # (TB, TS)
    l_sc[...] = alpha * l_sc[...] + jnp.sum(p, axis=-1, keepdims=True)

    # Numerator: att * mask (matches PyTorch: att_w = softmax(...) * mask).
    p_num = p * mask if has_mask else p
    acc_sc[...] = alpha * acc_sc[...] + jnp.sum(
        p_num[:, :, None] * enc.astype(jnp.float32), axis=1)   # (TB, Hp)
    m_sc[...] = m_new

    @pl.when(si == pl.num_programs(1) - 1)
    def _finalize():
        denom = l_sc[...]
        # EUP approximate reciprocal + one Newton step (no vector divide).
        r = pl.reciprocal(denom, approx=True)
        r = r * (2.0 - denom * r)
        out_ref[...] = (acc_sc[...] * r).astype(out_ref.dtype)


def _vmem_capacity_bytes():
    try:
        return int(pltpu.get_tpu_info().vmem_capacity_bytes)
    except Exception:
        return 64 * 1024 * 1024  # conservative floor (v7x per-core VMEM)


def _choose_tiles(B, S, Hp, itemsize, tile_budget):
    """Pick (TB, TS, Sp) so double-buffered blocks + f32 temps fit the budget.

    Per (batch-row, seq-position): 2*Hp*itemsize (enc dbuf) + ~2*Hp*4 (f32 temps)
    + 2*itemsize (mask dbuf) + score/p temps.  Per batch-row: proj/out dbuf + acc.
    """
    per_bs = Hp * (2 * itemsize + 8) + 2 * itemsize + 16
    per_b = Hp * (2 * itemsize + 12) + 64
    TB = min(_round_up(B, 8), 256)
    while True:
        avail = tile_budget - TB * per_b
        ts_fit = avail // (TB * per_bs) if avail > 0 else 0
        if ts_fit >= S:
            return TB, S, S                       # whole sequence in one step
        if ts_fit >= 128:
            TS = int(ts_fit // 128) * 128         # lane-dense S tiles
            return TB, TS, _round_up(S, TS)
        if TB > 8:
            TB = max(8, ((TB // 2) // 8) * 8)     # shrink batch tile first
        else:
            return 8, 128, _round_up(S, 128)      # smallest legal tiles


def attention_forward(hidden, encoder_outputs, weight, mask=None, *,
                      _tile_budget_bytes=None):
    """Forward pass of Attention(hidden_size, method='general') (bias-free linear).

    hidden:          (B, H)
    encoder_outputs: (B, S, H)
    weight:          (H, H)   nn.Linear weight, shape (out_features, in_features)
    mask:            (B, S) or None
    returns:         (B, H)   attention context vectors
    """
    B, H = hidden.shape
    Be, S, He = encoder_outputs.shape
    assert (Be, He) == (B, H)
    dtype = hidden.dtype
    itemsize = jnp.dtype(dtype).itemsize

    Hp = _round_up(H, 128)                       # lane-dense feature dim

    capacity = _vmem_capacity_bytes()
    vmem_limit = int(0.75 * capacity)
    tile_budget = int(0.60 * capacity) if _tile_budget_bytes is None \
        else int(_tile_budget_bytes)
    TB, TS, Sp = _choose_tiles(B, S, Hp, itemsize, tile_budget)
    Bp = _round_up(B, TB)

    # Projection hoisted out of the kernel: one XLA matmul over all rows; the
    # weight never enters VMEM.  Kept in f32 (tiny: Bp x Hp).
    proj = jnp.dot(hidden, weight.T, preferred_element_type=jnp.float32)
    proj_p = jnp.pad(proj, ((0, Bp - B), (0, Hp - H)))
    # Zero padding is exact: padded H columns contribute 0 to the dot products,
    # padded S positions are forced to -inf in-kernel, padded B rows are sliced off.
    enc_p = jnp.pad(encoder_outputs, ((0, Bp - B), (0, Sp - S), (0, Hp - H)))

    in_specs = [
        pl.BlockSpec((TB, Hp), lambda b, s: (b, 0)),          # projected query rows
        pl.BlockSpec((TB, TS, Hp), lambda b, s: (b, s, 0)),   # encoder tile
    ]
    args = [proj_p, enc_p]
    has_mask = mask is not None
    bytes_accessed = 4 * Bp * Hp + itemsize * Bp * Sp * Hp + itemsize * Bp * Hp
    if has_mask:
        mask_p = jnp.pad(mask.astype(dtype), ((0, Bp - B), (0, Sp - S)))
        in_specs.append(pl.BlockSpec((TB, TS), lambda b, s: (b, s)))
        args.append(mask_p)
        bytes_accessed += itemsize * Bp * Sp

    kernel = functools.partial(_attn_kernel, has_mask=has_mask,
                               s_len=S, ts=TS, s_padded=(Sp != S))

    cost = pl.CostEstimate(
        flops=4 * Bp * Sp * Hp,            # two multiply-add contractions
        transcendentals=Bp * Sp,           # exp
        bytes_accessed=bytes_accessed,
    )

    # TODO(synk): on v7x (2 TCs) mark the batch axis CORE_PARALLEL and ensure
    # >=2 grid steps per core once a reliable core-count query is available;
    # on single-TC v5e/v6e the largest tile is always preferred.
    out_p = pl.pallas_call(
        kernel,
        out_shape=jax.ShapeDtypeStruct((Bp, Hp), dtype),
        grid_spec=pltpu.PrefetchScalarGridSpec(
            num_scalar_prefetch=0,
            grid=(Bp // TB, Sp // TS),
            in_specs=in_specs,
            out_specs=pl.BlockSpec((TB, Hp), lambda b, s: (b, 0)),
            scratch_shapes=[
                pltpu.VMEM((TB, 1), jnp.float32),   # running max m
                pltpu.VMEM((TB, 1), jnp.float32),   # running denom l
                pltpu.VMEM((TB, Hp), jnp.float32),  # running context acc
            ],
        ),
        compiler_params=pltpu.CompilerParams(
            dimension_semantics=("parallel", "arbitrary"),
            vmem_limit_bytes=vmem_limit,
        ),
        cost_estimate=cost,
    )(*args)

    return out_p[:B, :H]


def _reference(hidden, encoder_outputs, weight, mask=None):
    proj = hidden @ weight.T
    score = jnp.einsum("bsh,bh->bs", encoder_outputs, proj)
    if mask is not None:
        score = score * mask
    att = jax.nn.softmax(score, axis=-1)
    if mask is not None:
        att = att * mask
    return jnp.einsum("bsh,bs->bh", encoder_outputs, att)


if __name__ == "__main__":
    key = jax.random.PRNGKey(0)
    k1, k2, k3, k4, k5, k6, k7 = jax.random.split(key, 7)

    # --- Small shapes consistent with the module (single S step) ---
    B, S, H = 2, 8, 32
    hidden = jax.random.normal(k1, (B, H), dtype=jnp.float32)
    encoder_outputs = jax.random.normal(k2, (B, S, H), dtype=jnp.float32)
    bound = (6.0 / (H + H)) ** 0.5  # xavier_uniform for nn.Linear(H, H, bias=False)
    weight = jax.random.uniform(k3, (H, H), minval=-bound, maxval=bound,
                                dtype=jnp.float32)
    mask = (jax.random.uniform(k4, (B, S)) > 0.3).astype(jnp.float32)

    out = jax.block_until_ready(attention_forward(hidden, encoder_outputs, weight))
    ref = _reference(hidden, encoder_outputs, weight)
    assert out.shape == (B, H)
    assert jnp.allclose(out, ref, atol=1e-4, rtol=1e-4), "mismatch (no mask)"

    out_m = jax.block_until_ready(
        attention_forward(hidden, encoder_outputs, weight, mask=mask))
    ref_m = _reference(hidden, encoder_outputs, weight, mask=mask)
    assert jnp.allclose(out_m, ref_m, atol=1e-4, rtol=1e-4), "mismatch (mask)"

    # --- Exercise the S-tiled online-softmax path (forced small VMEM budget) ---
    B2, S2, H2 = 2, 200, 32
    hidden2 = jax.random.normal(k5, (B2, H2), dtype=jnp.float32)
    enc2 = jax.random.normal(k6, (B2, S2, H2), dtype=jnp.float32)
    mask2 = (jax.random.uniform(k7, (B2, S2)) > 0.3).astype(jnp.float32)

    small_budget = 2621440  # ~2.5 MiB -> forces TS=128, Sp=256 (2 S steps + pad)
    out2 = jax.block_until_ready(
        attention_forward(hidden2, enc2, weight, _tile_budget_bytes=small_budget))
    ref2 = _reference(hidden2, enc2, weight)
    assert jnp.allclose(out2, ref2, atol=1e-4, rtol=1e-4), "mismatch (S-tiled, no mask)"

    out2_m = jax.block_until_ready(
        attention_forward(hidden2, enc2, weight, mask=mask2,
                          _tile_budget_bytes=small_budget))
    ref2_m = _reference(hidden2, enc2, weight, mask=mask2)
    assert jnp.allclose(out2_m, ref2_m, atol=1e-4, rtol=1e-4), "mismatch (S-tiled, mask)"

    print("KERNEL_OK")
</pallas_src>

<mosaic_0001>
module attributes {stable_mosaic.version = 11 : i64} {
  func.func @_attn_kernel(%arg0: i32, %arg1: i32, %arg2: memref<8x128xf32, #tpu.memory_space<vmem>>, %arg3: memref<8x8x128xf32, #tpu.memory_space<vmem>>, %arg4: memref<8x128xf32, #tpu.memory_space<vmem>>, %arg5: memref<8x1xf32, #tpu.memory_space<vmem>>, %arg6: memref<8x1xf32, #tpu.memory_space<vmem>>, %arg7: memref<8x128xf32, #tpu.memory_space<vmem>>) attributes {dimension_semantics = [#tpu.dimension_semantics<parallel>, #tpu.dimension_semantics<arbitrary>], iteration_bounds = array<i64: 1, 1>, scalar_prefetch = 0 : i64, scratch_operands = 3 : i64, tpu.core_type = #tpu.core_type<tc>, window_params = [{transform_indices = @transform_0, window_bounds = array<i64: 8, 128>}, {transform_indices = @transform_1, window_bounds = array<i64: 8, 8, 128>}, {transform_indices = @transform_2, window_bounds = array<i64: 8, 128>}]} {
    %c0_i32 = arith.constant 0 : i32
    %0 = arith.cmpi eq, %arg1, %c0_i32 : i32
    %1 = arith.extui %0 : i1 to i32
    %c0_i32_0 = arith.constant 0 : i32
    %2 = arith.cmpi ne, %1, %c0_i32_0 : i32
    scf.if %2 {
      %cst_22 = arith.constant 0xFF800000 : f32
      %37 = vector.broadcast %cst_22 : f32 to vector<8x1xf32>
      %c0_23 = arith.constant 0 : index
      %c0_24 = arith.constant 0 : index
      %38 = vector.load %arg5[%c0_23, %c0_24] : memref<8x1xf32, #tpu.memory_space<vmem>>, vector<8x1xf32>
      tpu.vector_store %arg5[%c0_23, %c0_24], %37 {strides = array<i32>} : memref<8x1xf32, #tpu.memory_space<vmem>>, vector<8x1xf32>,
      %cst_25 = arith.constant 0.000000e+00 : f32
      %39 = vector.broadcast %cst_25 : f32 to vector<8x1xf32>
      %c0_26 = arith.constant 0 : index
      %c0_27 = arith.constant 0 : index
      %40 = vector.load %arg6[%c0_26, %c0_27] : memref<8x1xf32, #tpu.memory_space<vmem>>, vector<8x1xf32>
      tpu.vector_store %arg6[%c0_26, %c0_27], %39 {strides = array<i32>} : memref<8x1xf32, #tpu.memory_space<vmem>>, vector<8x1xf32>,
      %cst_28 = arith.constant 0.000000e+00 : f32
      %41 = vector.broadcast %cst_28 : f32 to vector<8x128xf32>
      %c0_29 = arith.constant 0 : index
      %c0_30 = arith.constant 0 : index
      %42 = vector.load %arg7[%c0_29, %c0_30] : memref<8x128xf32, #tpu.memory_space<vmem>>, vector<8x128xf32>
      tpu.vector_store %arg7[%c0_29, %c0_30], %41 {strides = array<i32>} : memref<8x128xf32, #tpu.memory_space<vmem>>, vector<8x128xf32>,
    } else {
    }
    %c0 = arith.constant 0 : index
    %c0_1 = arith.constant 0 : index
    %3 = vector.load %arg2[%c0, %c0_1] : memref<8x128xf32, #tpu.memory_space<vmem>>, vector<8x128xf32>
    %c0_2 = arith.constant 0 : index
    %c0_3 = arith.constant 0 : index
    %c0_4 = arith.constant 0 : index
    %4 = vector.load %arg3[%c0_2, %c0_3, %c0_4] : memref<8x8x128xf32, #tpu.memory_space<vmem>>, vector<8x8x128xf32>
    %5 = vector.shape_cast %3 : vector<8x128xf32> to vector<8x1x128xf32>
    %6 = vector.broadcast %5 : vector<8x1x128xf32> to vector<8x8x128xf32>
    %7 = arith.mulf %4, %6 : vector<8x8x128xf32>
    %cst = arith.constant dense<0.000000e+00> : vector<8x8xf32>
    %8 = vector.multi_reduction <add>, %7, %cst [2] : vector<8x8x128xf32> to vector<8x8xf32>
    %c0_5 = arith.constant 0 : index
    %c0_6 = arith.constant 0 : index
    %9 = vector.load %arg5[%c0_5, %c0_6] : memref<8x1xf32, #tpu.memory_space<vmem>>, vector<8x1xf32>
    %cst_7 = arith.constant dense<0xFF800000> : vector<8xf32>
    %10 = vector.multi_reduction <maximumf>, %8, %cst_7 [1] : vector<8x8xf32> to vector<8xf32>
    %11 = vector.shape_cast %10 : vector<8xf32> to vector<8x1xf32>
    %12 = arith.maximumf %9, %11 : vector<8x1xf32>
    %13 = arith.subf %9, %12 : vector<8x1xf32>
    %14 = math.exp %13 : vector<8x1xf32>
    %15 = vector.broadcast %12 : vector<8x1xf32> to vector<8x8xf32>
    %16 = arith.subf %8, %15 : vector<8x8xf32>
    %17 = math.exp %16 : vector<8x8xf32>
    %c0_8 = arith.constant 0 : index
    %c0_9 = arith.constant 0 : index
    %18 = vector.load %arg6[%c0_8, %c0_9] : memref<8x1xf32, #tpu.memory_space<vmem>>, vector<8x1xf32>
    %19 = arith.mulf %14, %18 : vector<8x1xf32>
    %cst_10 = arith.constant dense<0.000000e+00> : vector<8xf32>
    %20 = vector.multi_reduction <add>, %17, %cst_10 [1] : vector<8x8xf32> to vector<8xf32>
    %21 = vector.shape_cast %20 : vector<8xf32> to vector<8x1xf32>
    %22 = arith.addf %19, %21 : vector<8x1xf32>
    %c0_11 = arith.constant 0 : index
    %c0_12 = arith.constant 0 : index
    %23 = vector.load %arg6[%c0_11, %c0_12] : memref<8x1xf32, #tpu.memory_space<vmem>>, vector<8x1xf32>
    tpu.vector_store %arg6[%c0_11, %c0_12], %22 {strides = array<i32>} : memref<8x1xf32, #tpu.memory_space<vmem>>, vector<8x1xf32>,
    %c0_13 = arith.constant 0 : index
    %c0_14 = arith.constant 0 : index
    %24 = vector.load %arg7[%c0_13, %c0_14] : memref<8x128xf32, #tpu.memory_space<vmem>>, vector<8x128xf32>
    %25 = vector.broadcast %14 : vector<8x1xf32> to vector<8x128xf32>
    %26 = arith.mulf %25, %24 : vector<8x128xf32>
    %27 = vector.shape_cast %17 : vector<8x8xf32> to vector<8x8x1xf32>
    %28 = vector.broadcast %27 : vector<8x8x1xf32> to vector<8x8x128xf32>
    %29 = arith.mulf %28, %4 : vector<8x8x128xf32>
    %cst_15 = arith.constant dense<0.000000e+00> : vector<8x128xf32>
    %30 = vector.multi_reduction <add>, %29, %cst_15 [1] : vector<8x8x128xf32> to vector<8x128xf32>
    %31 = arith.addf %26, %30 : vector<8x128xf32>
    %c0_16 = arith.constant 0 : index
    %c0_17 = arith.constant 0 : index
    %32 = vector.load %arg7[%c0_16, %c0_17] : memref<8x128xf32, #tpu.memory_space<vmem>>, vector<8x128xf32>
    tpu.vector_store %arg7[%c0_16, %c0_17], %31 {strides = array<i32>} : memref<8x128xf32, #tpu.memory_space<vmem>>, vector<8x128xf32>,
    %c0_18 = arith.constant 0 : index
    %c0_19 = arith.constant 0 : index
    %33 = vector.load %arg5[%c0_18, %c0_19] : memref<8x1xf32, #tpu.memory_space<vmem>>, vector<8x1xf32>
    tpu.vector_store %arg5[%c0_18, %c0_19], %12 {strides = array<i32>} : memref<8x1xf32, #tpu.memory_space<vmem>>, vector<8x1xf32>,
    %c0_i32_20 = arith.constant 0 : i32
    %34 = arith.cmpi eq, %arg1, %c0_i32_20 : i32
    %35 = arith.extui %34 : i1 to i32
    %c0_i32_21 = arith.constant 0 : i32
    %36 = arith.cmpi ne, %35, %c0_i32_21 : i32
    scf.if %36 {
      %c0_22 = arith.constant 0 : index
      %c0_23 = arith.constant 0 : index
      %37 = vector.load %arg6[%c0_22, %c0_23] : memref<8x1xf32, #tpu.memory_space<vmem>>, vector<8x1xf32>
      %38 = tpu.reciprocal %37 {approx = true} : vector<8x1xf32> -> vector<8x1xf32>
      %39 = arith.mulf %37, %38 : vector<8x1xf32>
      %cst_24 = arith.constant 2.000000e+00 : f32
      %40 = vector.broadcast %cst_24 : f32 to vector<8x1xf32>
      %41 = arith.subf %40, %39 : vector<8x1xf32>
      %42 = arith.mulf %38, %41 : vector<8x1xf32>
      %c0_25 = arith.constant 0 : index
      %c0_26 = arith.constant 0 : index
      %43 = vector.load %arg7[%c0_25, %c0_26] : memref<8x128xf32, #tpu.memory_space<vmem>>, vector<8x128xf32>
      %44 = vector.broadcast %42 : vector<8x1xf32> to vector<8x128xf32>
      %45 = arith.mulf %43, %44 : vector<8x128xf32>
      %c0_27 = arith.constant 0 : index
      %c0_28 = arith.constant 0 : index
      %46 = vector.load %arg4[%c0_27, %c0_28] : memref<8x128xf32, #tpu.memory_space<vmem>>, vector<8x128xf32>
      tpu.vector_store %arg4[%c0_27, %c0_28], %45 {strides = array<i32>} : memref<8x128xf32, #tpu.memory_space<vmem>>, vector<8x128xf32>,
    } else {
    }
    return
  }
  func.func @transform_0(%arg0: i32, %arg1: i32) -> (i32, i32) {
    %c0_i32 = arith.constant 0 : i32
    %c0_i32_0 = arith.constant 0 : i32
    return %arg0, %c0_i32 : i32, i32
  }
  func.func @transform_1(%arg0: i32, %arg1: i32) -> (i32, i32, i32) {
    %c0_i32 = arith.constant 0 : i32
    %c0_i32_0 = arith.constant 0 : i32
    return %arg0, %arg1, %c0_i32 : i32, i32, i32
  }
  func.func @transform_2(%arg0: i32, %arg1: i32) -> (i32, i32) {
    %c0_i32 = arith.constant 0 : i32
    %c0_i32_0 = arith.constant 0 : i32
    return %arg0, %c0_i32 : i32, i32
  }
}

</mosaic_0001>

<bundles_post_ra>
// kernel: tpu_custom_call.1
= control target key start
LH: loop header
LB: loop body
LE: loop exit
PB: predicated region body
PF: predicated region fallthrough
CT: control target
= control target key end

     0   :  { %7 = vsyncpa [#allocation6], 0  ;;  %s756_s0 = inlined_call_operand.hbm [shape: f32[8,128], index: 0, kind: input, shape index: {}]   ;;  %s757_s1 = inlined_call_operand.hbm [shape: f32[8,8,128], index: 1, kind: input, shape index: {}]   ;;  %s758_s2 = inlined_call_operand.hbm [shape: f32[8,128], index: 2, kind: output, shape index: {}]  }
   0x1   :  { %8 = vsyncpa [#allocation9], 0 }
   0x2   :  { %9 = vsyncpa [#allocation7], 0  ;;  %s603_s9 = smov [#allocation5]   ;;  %s604_s11 = smov [#allocation8]  }
   0x3   :  { %s16_s10 = sshll.u32 %s603_s9, 4  ;;  %s25_s12 = sshll.u32 %s604_s11, 4  ;;  %s17_s10 = int_to_ptr.vmem [resolvable:$true] %s16_s10  ;;  %s26_s12 = int_to_ptr.vmem [resolvable:$true] %s25_s12 }
   0x4   :  { %s545_s13 = scalar_lea.vmem %s17_s10, 128  ;;  %p550_p1 = scmp.lt.s32.totalorder %s17_s10, %s17_s10 }
   0x5   :  { %p546_p0 = scmp.ne.s32.totalorder %s17_s10, %s545_s13  ;;  %p551_p2 = scmp.lt.s32.totalorder %s545_s13, %s545_s13 }
   0x7   :  { %p552_p3 = por %p551_p2, %p550_p1 }
   0x9   :  { %p553_p4 = pnand %p552_p3, %p546_p0 }
   0xb   :  { %556 = shalt.err (!%p553_p4)
}
   0xc   :  { %19 = dma.hbm_to_vmem [thread:$0]  %s756_s0, 128, %s17_s10, [#allocation6]  }
   0xd   :  { %s565_s16 = scalar_lea.vmem %s26_s12, 1024  ;;  %p570_p6 = scmp.lt.s32.totalorder %s26_s12, %s26_s12 }
   0xe   :  { %p566_p5 = scmp.ne.s32.totalorder %s26_s12, %s565_s16  ;;  %p571_p7 = scmp.lt.s32.totalorder %s565_s16, %s565_s16 }
  0x10   :  { %p572_p8 = por %p571_p7, %p570_p6 }
  0x12   :  { %p573_p9 = pnand %p572_p8, %p566_p5 }
  0x14   :  { %576 = shalt.err (!%p573_p9)
}
  0x15   :  { %s605_s17 = smov 128   ;;  %s606_s18 = smov 8  }
  0x16   :  { %31 = dma.hbm_to_vmem [thread:$0]  %s757_s1, 1024, %s26_s12, [#allocation9], %s605_s17, %s605_s17, %s606_s18  }
  0x17   :  { %597 = dma.done.wait [#allocation6], 128  }
  0x18   :  { %598 = vsyncadd [#allocation6], 4294967168 }
  0x19   :  { %599 = dma.done.wait [#allocation9], 1024  }
  0x1a   :  { %600 = vsyncadd [#allocation9], 4294966272  ;;  %v60_v0 = vlaneseq  ;;  %v607_v1 = vmov 1966171168   ;;  %v46_v6 = vld [vmem:[#allocation5] sm:$0xff]  ;;  %v639_v13 = vld [vmem:[#allocation8] sm:$0xff] }
  0x1b   :  { %v58_v2 = vunpack.c.l.s4 %v607_v1  ;;  %v56_v9 = vcombine.high %v46_v6, %v46_v6  ;;  %v642_v18 = vld [vmem:[#allocation8 + $0x10] sm:$0xff]  ;;  %v644_v19 = vld [vmem:[#allocation8 + $0x8] sm:$0xff]  ;;  %v649_v25 = vld [vmem:[#allocation8 + $0x18] sm:$0xff]  ;;  %vm42_vm0 = vcmask 7168   ;;  %v608_v45 = vmov -inf   ;;  %s611_s0 = smov [#allocation10]  }
  0x1c   :  { %v633_v3 = vshrl.u32 %v60_v0, 7  ;;  %v655_v32 = vld [vmem:[#allocation8 + $0x20] sm:$0xff]  ;;  %v659_v36 = vld [vmem:[#allocation8 + $0x28] sm:$0xff]  ;;  %v663_v39 = vld [vmem:[#allocation8 + $0x30] sm:$0xff]  ;;  %43 = vst.msk [vmem:[#allocation2] sm:$0xff] %vm42_vm0, %v608_v45  ;;  %v179_v46 = vand.u32 127, %v60_v0 }
  0x1d   :  { %v59_v4 = vunpack.c.0.s8 %v58_v2  ;;  %v667_v42 = vld [vmem:[#allocation8 + $0x38] sm:$0xff]  ;;  %vm212_vm1 = vcmask 1041409   ;;  %vm214_vm2 = vcmask 1042434   ;;  %vm216_vm3 = vcmask 1043459   ;;  %s495_s1 = sshll.u32 %s611_s0, 4  ;;  %s496_s1 = int_to_ptr.vmem [resolvable:$true] %s495_s1 }
  0x1e   :  { %v637_v8 = vsub.s32 0, %v633_v3  ;;  %v673_v48 = vsub.s32 %v179_v46, %v633_v3  ;;  %vm218_vm4 = vcmask 1044484   ;;  %vm220_vm5 = vcmask 1045509   ;;  %s577_s21 = scalar_lea.vmem %s496_s1, 128  ;;  %p582_p11 = scmp.lt.s32.totalorder %s496_s1, %s496_s1 }
  0x1f   :  { %v62_v5 = vsub.s32 %v59_v4, %v633_v3  ;;  %vm222_vm6 = vcmask 1046534   ;;  %vm224_vm7 = vcmask 1047559   ;;  %vm227_vm8 = vcmask 64512   ;;  %p578_p10 = scmp.ne.s32.totalorder %s496_s1, %s577_s21  ;;  %p583_p12 = scmp.lt.s32.totalorder %s577_s21, %s577_s21 }
  0x20   :  { %v269_v46 = vsub.s32 7, %v633_v3 }
  0x21   :  { %v63_v7 = vrot.slane %v46_v6, %v62_v5  ;;  %v70_v12 = vrot.slane %v56_v9, %v62_v5  ;;  %p584_p13 = por %p583_p12, %p582_p11 }
  0x23   :  { %v79_v10 = vrot.slane %v63_v7, %v62_v5  ;;  %v71_v11 = vcombine.high %v63_v7, %v63_v7  ;;  %v86_v17 = vrot.slane %v70_v12, %v62_v5  ;;  %v72_v20 = vcombine.high %v70_v12, %v70_v12  ;;  %v169_v12 = vld [vmem:[#allocation2] sm:$0xff]  ;;  %p585_p0 = pnand %p584_p13, %p578_p10 }
  0x25   :  { %v108_v14 = vrot.slane %v79_v10, %v637_v8  ;;  %v101_v15 = vcombine.high %v79_v10, %v79_v10  ;;  %v93_v16 = vrot.slane %v71_v11, %v62_v5  ;;  %v124_v26 = vrot.slane %v86_v17, %v637_v8 }
  0x26   :  { %v100_v27 = vrot.slane %v72_v20, %v62_v5  ;;  %v102_v31 = vcombine.high %v86_v17, %v86_v17  ;;  %v609_v10 = vmov 0   ;;  %v610_v11 = vmov 0.0  }
  0x27   :  { %v145_v21 = vmul.f32 %v108_v14, %v639_v13  ;;  %v116_v22 = vrot.slane %v101_v15, %v637_v8  ;;  %v112_v23 = vrot.slane %v93_v16, %v637_v8  ;;  %v103_v24 = vcombine.high %v93_v16, %v93_v16  ;;  %514 = vset.pattern.permute.xlu1 %v609_v10 }
  0x28   :  { %v128_v34 = vrot.slane %v100_v27, %v637_v8  ;;  %v104_v35 = vcombine.high %v100_v27, %v100_v27  ;;  %v149_v37 = vmul.f32 %v124_v26, %v655_v32  ;;  %v132_v38 = vrot.slane %v102_v31, %v637_v8  ;;  %515 = vset.pattern.permute.xlu0 %v609_v10 }
  0x29   :  { %153 = vadd.xlane.f32.xlu0 %v145_v21  ;;  %v147_v28 = vmul.f32 %v116_v22, %v642_v18  ;;  %v146_v29 = vmul.f32 %v112_v23, %v644_v19  ;;  %v120_v30 = vrot.slane %v103_v24, %v637_v8  ;;  %44 = vst.msk [vmem:[#allocation3] sm:$0xff] %vm42_vm0, %v610_v11  ;;  %v245_v17 = vsub.s32 1, %v633_v3 }
  0x2a   :  { %v150_v40 = vmul.f32 %v128_v34, %v659_v36  ;;  %v136_v41 = vrot.slane %v104_v35, %v637_v8  ;;  %v151_v43 = vmul.f32 %v132_v38, %v663_v39  ;;  %v249_v20 = vsub.s32 2, %v633_v3 }
  0x2b   :  { %157 = vadd.xlane.f32.xlu1 %v147_v28  ;;  %v148_v33 = vmul.f32 %v120_v30, %v649_v25  ;;  %v253_v21 = vsub.s32 3, %v633_v3 }
  0x2c   :  { %v152_v44 = vmul.f32 %v136_v41, %v667_v42 }
  0x2d   :  { %155 = vadd.xlane.f32.xlu0 %v146_v29  ;;  %v257_v29 = vsub.s32 4, %v633_v3 }
  0x2f   :  { %159 = vadd.xlane.f32.xlu1 %v148_v33 }
  0x31   :  { %161 = vadd.xlane.f32.xlu0 %v149_v37  ;;  %v261_v37 = vsub.s32 5, %v633_v3 }
  0x33   :  { %163 = vadd.xlane.f32.xlu1 %v150_v40 }
  0x35   :  { %165 = vadd.xlane.f32.xlu0 %v151_v43 }
  0x37   :  { %167 = vadd.xlane.f32.xlu1 %v152_v44 }
  0xb2   :  { %v154_v47 = vpop.xlane.xlu0 %153 }
  0xb3   :  { %v183_v51 = vrot.slane %v154_v47, %v673_v48 }
  0xb4   :  { %v675_v49 = vpop.xlane.xlu1 %157 }
  0xb5   :  { %v191_v53 = vrot.slane %v675_v49, %v673_v48 }
  0xb6   :  { %v156_v50 = vpop.xlane.xlu0 %155 }
  0xb7   :  { %v187_v52 = vrot.slane %v156_v50, %v673_v48 }
  0xb8   :  { %v160_v54 = vpop.xlane.xlu1 %159 }
  0xb9   :  { %v213_v55 = vsel %vm212_vm1, %v187_v52, %v183_v51  ;;  %v195_v56 = vrot.slane %v160_v54, %v673_v48 }
  0xba   :  { %v215_v57 = vsel %vm214_vm2, %v191_v53, %v213_v55  ;;  %v162_v58 = vpop.xlane.xlu0 %161 }
  0xbb   :  { %v217_v59 = vsel %vm216_vm3, %v195_v56, %v215_v57  ;;  %v199_v60 = vrot.slane %v162_v58, %v673_v48 }
  0xbc   :  { %v686_v61 = vpop.xlane.xlu1 %163 }
  0xbd   :  { %v219_v62 = vsel %vm218_vm4, %v199_v60, %v217_v59  ;;  %v203_v63 = vrot.slane %v686_v61, %v673_v48 }
  0xbe   :  { %v691_v0 = vpop.xlane.xlu0 %165 }
  0xbf   :  { %v207_v1 = vrot.slane %v691_v0, %v673_v48  ;;  %v221_v2 = vsel %vm220_vm5, %v203_v63, %v219_v62 }
  0xc0   :  { %v696_v4 = vpop.xlane.xlu1 %167 }
  0xc1   :  { %v211_v5 = vrot.slane %v696_v4, %v673_v48  ;;  %v223_v6 = vsel %vm222_vm6, %v207_v1, %v221_v2 }
  0xc3   :  { %v225_v7 = vsel %vm224_vm7, %v211_v5, %v223_v6 }
  0xc4   :  { %v228_v9 = vsel %vm227_vm8, %v225_v7, -inf }
  0xc5   :  { %229 = vmax.xlane.f32.xlu0 %v228_v9 }
 0x14e   :  { %v230_v14 = vpop.xlane.xlu0 %229 }
 0x14f   :  { %v231_v15 = vmax.f32 %v169_v12, %v230_v14 }
 0x151   :  { %v232_v16 = vsub.f32 %v169_v12, %v231_v15  ;;  %472 = vst.msk [vmem:[#allocation2] sm:$0xff] %vm42_vm0, %v231_v15  ;;  %237 = vperm.xlu1 %514, %v231_v15  }
 0x153   :  { %v233_v35 = vmul.f32 1.442695, %v232_v16 }
 0x1cc   :  { %v238_v22 = vpop.permute.xlu1 %237 }
 0x1cd   :  { %v242_v23 = vrot.slane %v238_v22, %v637_v8  ;;  %v246_v24 = vrot.slane %v238_v22, %v245_v17  ;;  %v250_v26 = vrot.slane %v238_v22, %v249_v20  ;;  %v254_v30 = vrot.slane %v238_v22, %v253_v21 }
 0x1ce   :  { %v258_v38 = vrot.slane %v238_v22, %v257_v29  ;;  %v265_v8 = vsub.s32 6, %v633_v3  ;;  %v262_v43 = vrot.slane %v238_v22, %v261_v37  ;;  %v270_v52 = vrot.slane %v238_v22, %v269_v46 }
 0x1cf   :  { %v279_v27 = vsub.f32 %v154_v47, %v242_v23  ;;  %v280_v28 = vsub.f32 %v156_v50, %v246_v24  ;;  %v281_v31 = vsub.f32 %v675_v49, %v250_v26  ;;  %v282_v40 = vsub.f32 %v160_v54, %v254_v30 }
 0x1d0   :  { %v283_v44 = vsub.f32 %v162_v58, %v258_v38  ;;  %v266_v47 = vrot.slane %v238_v22, %v265_v8  ;;  %v284_v49 = vsub.f32 %v686_v61, %v262_v43  ;;  %v286_v57 = vsub.f32 %v696_v4, %v270_v52 }
 0x1d1   :  { %v287_v33 = vmul.f32 1.442695, %v279_v27  ;;  %v289_v34 = vmul.f32 1.442695, %v280_v28  ;;  %v291_v41 = vmul.f32 1.442695, %v281_v31 }
 0x1d2   :  { %v293_v45 = vmul.f32 1.442695, %v282_v40  ;;  %v295_v50 = vmul.f32 1.442695, %v283_v44  ;;  %v285_v53 = vsub.f32 %v691_v0, %v266_v47  ;;  %v297_v54 = vmul.f32 1.442695, %v284_v49 }
 0x1d3   :  { %517 = vpow2.f32 %v287_v33  ;;  %v301_v59 = vmul.f32 1.442695, %v286_v57 }
 0x1d4   :  { %519 = vpow2.f32 %v289_v34  ;;  %v299_v3 = vmul.f32 1.442695, %v285_v53 }
 0x1d5   :  { %521 = vpow2.f32 %v233_v35 }
 0x1d6   :  { %523 = vpow2.f32 %v291_v41 }
 0x1d7   :  { %525 = vpow2.f32 %v293_v45 }
 0x1d8   :  { %527 = vpow2.f32 %v295_v50 }
 0x1d9   :  { %529 = vpow2.f32 %v297_v54 }
 0x1da   :  { %531 = vpow2.f32 %v299_v3 }
 0x1db   :  { %533 = vpow2.f32 %v301_v59 }
 0x1e0   :  { %v518_v51 = vpop.eup %517 }
 0x1e1   :  { %v520_v55 = vpop.eup %519  ;;  %314 = vperm.xlu0 %515, %v518_v51  }
 0x1e2   :  { %317 = vperm.xlu1 %514, %v520_v55   ;;  %v716_v56 = vpop.eup %521 }
 0x1e3   :  { %v524_v58 = vpop.eup %523 }
 0x1e4   :  { %v526_v60 = vpop.eup %525 }
 0x1e5   :  { %386 = vperm.xlu0 %515, %v716_v56   ;;  %v528_v61 = vpop.eup %527 }
 0x1e6   :  { %320 = vperm.xlu1 %514, %v524_v58   ;;  %v530_v62 = vpop.eup %529 }
 0x1e7   :  { %v532_v63 = vpop.eup %531 }
 0x1e8   :  { %v534_v0 = vpop.eup %533 }
 0x1ea   :  { %323 = vperm.xlu1 %514, %v526_v60  }
 0x1ee   :  { %326 = vperm.xlu1 %514, %v528_v61  }
 0x1f2   :  { %329 = vperm.xlu1 %514, %v530_v62  }
 0x1f6   :  { %332 = vperm.xlu1 %514, %v532_v63  }
 0x1fa   :  { %335 = vperm.xlu1 %514, %v534_v0  }
 0x25c   :  { %v315_v1 = vpop.permute.xlu0 %314 }
 0x25d   :  { %v318_v2 = vpop.permute.xlu1 %317  ;;  %v398_v4 = vmul.f32 %v315_v1, %v639_v13  ;;  %v340_v38 = vrot.slane %v315_v1, %v673_v48 }
 0x25e   :  { %v399_v5 = vmul.f32 %v318_v2, %v644_v19  ;;  %v344_v37 = vrot.slane %v318_v2, %v673_v48 }
 0x25f   :  { %v406_v6 = vrot.slane %v398_v4, 4 }
 0x260   :  { %v412_v7 = vrot.slane %v399_v5, 4  ;;  %v369_v50 = vsel %vm212_vm1, %v344_v37, %v340_v38 }
 0x261   :  { %v407_v9 = vadd.f32 %v406_v6, %v398_v4  ;;  %v321_v10 = vpop.permute.xlu1 %320 }
 0x262   :  { %v413_v11 = vadd.f32 %v412_v7, %v399_v5  ;;  %v400_v12 = vmul.f32 %v321_v10, %v642_v18  ;;  %v348_v44 = vrot.slane %v321_v10, %v673_v48 }
 0x263   :  { %v408_v14 = vrot.slane %v407_v9, 2 }
 0x264   :  { %v414_v15 = vrot.slane %v413_v11, 2  ;;  %v418_v16 = vrot.slane %v400_v12, 4  ;;  %v370_v3 = vsel %vm214_vm2, %v348_v44, %v369_v50 }
 0x265   :  { %v409_v17 = vadd.f32 %v408_v14, %v407_v9  ;;  %v324_v20 = vpop.permute.xlu1 %323 }
 0x266   :  { %v415_v21 = vadd.f32 %v414_v15, %v413_v11  ;;  %v419_v22 = vadd.f32 %v418_v16, %v400_v12  ;;  %v401_v23 = vmul.f32 %v324_v20, %v649_v25 }
 0x267   :  { %v410_v24 = vrot.slane %v409_v17, 1 }
 0x268   :  { %v416_v13 = vrot.slane %v415_v21, 1  ;;  %v420_v26 = vrot.slane %v419_v22, 2  ;;  %v424_v19 = vrot.slane %v401_v23, 4 }
 0x269   :  { %v411_v27 = vadd.f32 %v410_v24, %v409_v17  ;;  %v327_v28 = vpop.permute.xlu1 %326 }
 0x26a   :  { %v417_v29 = vadd.f32 %v416_v13, %v415_v21  ;;  %v421_v30 = vadd.f32 %v420_v26, %v419_v22  ;;  %v425_v31 = vadd.f32 %v424_v19, %v401_v23  ;;  %v402_v18 = vmul.f32 %v327_v28, %v655_v32  ;;  %v303_v23 = vld [vmem:[#allocation3] sm:$0xff] }
 0x26b   :  { %v352_v32 = vrot.slane %v324_v20, %v673_v48  ;;  %v356_v51 = vrot.slane %v327_v28, %v673_v48  ;;  %v304_v24 = vmul.f32 %v716_v56, %v303_v23  ;;  %v387_v56 = vpop.permute.xlu0 %386 }
 0x26c   :  { %v462_v33 = vsel %vm212_vm1, %v417_v29, %v411_v27  ;;  %v422_v34 = vrot.slane %v421_v30, 1  ;;  %v426_v35 = vrot.slane %v425_v31, 2  ;;  %v430_v25 = vrot.slane %v402_v18, 4 }
 0x26d   :  { %v330_v40 = vpop.permute.xlu1 %329  ;;  %v371_v60 = vsel %vm216_vm3, %v352_v32, %v370_v3 }
 0x26e   :  { %v423_v41 = vadd.f32 %v422_v34, %v421_v30  ;;  %v427_v8 = vadd.f32 %v426_v35, %v425_v31  ;;  %v403_v43 = vmul.f32 %v330_v40, %v659_v36  ;;  %v431_v45 = vadd.f32 %v430_v25, %v402_v18 }
 0x26f   :  { %v360_v55 = vrot.slane %v330_v40, %v673_v48  ;;  %v372_v0 = vsel %vm218_vm4, %v356_v51, %v371_v60  ;;  %v389_v40 = vmul.f32 0.0, %v387_v56 }
 0x270   :  { %v463_v46 = vsel %vm214_vm2, %v423_v41, %v462_v33  ;;  %v428_v47 = vrot.slane %v427_v8, 1  ;;  %v436_v49 = vrot.slane %v403_v43, 4  ;;  %v432_v52 = vrot.slane %v431_v45, 2 }
 0x271   :  { %v333_v53 = vpop.permute.xlu1 %332 }
 0x272   :  { %v429_v54 = vadd.f32 %v428_v47, %v427_v8  ;;  %v437_v57 = vadd.f32 %v436_v49, %v403_v43  ;;  %v404_v36 = vmul.f32 %v333_v53, %v663_v39  ;;  %v433_v58 = vadd.f32 %v432_v52, %v431_v45 }
 0x273   :  { %v364_v59 = vrot.slane %v333_v53, %v673_v48  ;;  %v373_v39 = vsel %vm220_vm5, %v360_v55, %v372_v0 }
 0x274   :  { %v464_v61 = vsel %vm216_vm3, %v429_v54, %v463_v46  ;;  %v438_v62 = vrot.slane %v437_v57, 2  ;;  %v442_v63 = vrot.slane %v404_v36, 4  ;;  %v434_v1 = vrot.slane %v433_v58, 1 }
 0x275   :  { %v336_v2 = vpop.permute.xlu1 %335  ;;  %v374_v9 = vsel %vm222_vm6, %v364_v59, %v373_v39 }
 0x276   :  { %v439_v4 = vadd.f32 %v438_v62, %v437_v57  ;;  %v443_v5 = vadd.f32 %v442_v63, %v404_v36  ;;  %v368_v6 = vrot.slane %v336_v2, %v673_v48  ;;  %v435_v7 = vadd.f32 %v434_v1, %v433_v58 }
 0x277   :  { %v405_v31 = vmul.f32 %v336_v2, %v667_v42 }
 0x278   :  { %v440_v10 = vrot.slane %v439_v4, 1  ;;  %v444_v11 = vrot.slane %v443_v5, 2  ;;  %v375_v12 = vsel %vm224_vm7, %v368_v6, %v374_v9  ;;  %v465_v15 = vsel %vm218_vm4, %v435_v7, %v464_v61 }
 0x279   :  { %v377_v14 = vsel %vm227_vm8, %v375_v12, 0.0  ;;  %v448_v18 = vrot.slane %v405_v31, 4 }
 0x27a   :  { %v441_v16 = vadd.f32 %v440_v10, %v439_v4  ;;  %v445_v17 = vadd.f32 %v444_v11, %v443_v5  ;;  %378 = vadd.xlane.f32.xlu1 %v377_v14 }
 0x27b   :  { %v449_v33 = vadd.f32 %v448_v18, %v405_v31 }
 0x27c   :  { %v446_v20 = vrot.slane %v445_v17, 1  ;;  %v466_v21 = vsel %vm220_vm5, %v441_v16, %v465_v15 }
 0x27d   :  { %v450_v34 = vrot.slane %v449_v33, 2 }
 0x27e   :  { %v447_v48 = vadd.f32 %v446_v20, %v445_v17 }
 0x27f   :  { %v451_v35 = vadd.f32 %v450_v34, %v449_v33 }
 0x280   :  { %v467_v22 = vsel %vm222_vm6, %v447_v48, %v466_v21 }
 0x281   :  { %v452_v37 = vrot.slane %v451_v35, 1 }
 0x283   :  { %v453_v38 = vadd.f32 %v452_v37, %v451_v35 }
 0x285   :  { %v468_v25 = vsel %vm224_vm7, %v453_v38, %v467_v22 }
 0x286   :  { %v470_v41 = vadd.f32 %v468_v25, %v389_v40 }
 0x303   :  { %v379_v13 = vpop.xlane.xlu1 %378 }
 0x304   :  { %v380_v26 = vadd.f32 %v379_v13, %v304_v24 }
 0x306   :  { %382 = vst.msk [vmem:[#allocation3] sm:$0xff] %vm42_vm0, %v380_v26 }
 0x30d   :  { %v476_v19 = vld [vmem:[#allocation3] sm:$0xff] }
 0x30e   :  { %535 = vrcp.f32 %v476_v19 }
 0x31b   :  { %v536_v27 = vpop.eup %535 }
 0x31c   :  { %v478_v28 = vmul.f32 %v536_v27, %v476_v19 }
 0x31e   :  { %v479_v29 = vsub.f32 2.0, %v478_v28 }
 0x320   :  { %v480_v30 = vmul.f32 %v536_v27, %v479_v29 }
 0x322   :  { %484 = vperm.xlu0 %515, %v480_v30  }
 0x39d   :  { %v485_v8 = vpop.permute.xlu0 %484 }
 0x39e   :  { %v487_v43 = vmul.f32 %v485_v8, %v470_v41 }
 0x3a0   :  { %488 = vst [vmem:[#allocation10] sm:$0xff] %v487_v43 }
 0x3a1   :  { %588 = shalt.err (!%p585_p0)
}
 0x3a2   :  { %498 = dma.vmem_to_hbm [thread:$0]  %s496_s1, 128, %s758_s2, [#allocation7]  }
 0x3a3   :  { %601 = dma.done.wait [#allocation7], 128  }
 0x3a4   :  { %602 = vsyncadd [#allocation7], 4294967168 }
 0x3a5   :  { %502 = vsyncpa [#allocation6], 1 }
 0x3a6   :  { %503 = vsyncpa [#allocation9], 1 }
 0x3a7   :  { %504 = vsyncpa [#allocation7], 1 }

</bundles_post_ra>
